<compile_context>
chip_gen: v7x
topology: tpu7x:2x2x1
jax: 0.10.0
libtpu: 0.0.40
codegen_flags: <defaults>
</compile_context>

<pallas_src>
import functools

import jax
import jax.numpy as jnp
from jax import lax
from jax.experimental import pallas as pl
from jax.experimental.pallas import tpu as pltpu

# q @ k^T via a transposed contraction (same dimension numbers as the
# official Pallas TPU flash-attention kernel).
_TRANS_B_DIMS = (((1,), (1,)), ((), ()))


def _qkv_proj_kernel(x_ref, wqkv_ref, bqkv_ref, q_ref, k_ref, v_ref, *, e_int):
    """Fused Q/K/V projection for one (batch, seq-tile) block.

    x_ref:    (1, T, Ep)   bf16 (lane-aligned embed dim)
    wqkv_ref: (Ep, 3*Ei)   bf16, pre-transposed [in, out], per-head padded,
                           softmax scaling folded into the Q columns
    bqkv_ref: (1, 3*Ei)    f32
    q/k/v:    (1, T, Ei)   bf16
    """
    x = x_ref[0]                                                    # (T, Ep)
    qkv = jnp.dot(x, wqkv_ref[...], preferred_element_type=jnp.float32)
    qkv = qkv + bqkv_ref[...]
    q_ref[0] = qkv[:, :e_int].astype(jnp.bfloat16)
    k_ref[0] = qkv[:, e_int:2 * e_int].astype(jnp.bfloat16)
    v_ref[0] = qkv[:, 2 * e_int:].astype(jnp.bfloat16)


def _attn_kernel(*refs, num_heads, head_dim_p, need_weights):
    """Per-(batch, query-tile) multi-head attention + output projection."""
    if need_weights:
        q_ref, k_ref, v_ref, wo_ref, bo_ref, out_ref, attn_ref, ctx_ref = refs
    else:
        q_ref, k_ref, v_ref, wo_ref, bo_ref, out_ref, ctx_ref = refs

    H, Dp = num_heads, head_dim_p
    Tq = q_ref.shape[1]
    S = k_ref.shape[1]
    bf16 = jnp.bfloat16

    if need_weights:
        probs_sum = jnp.zeros((Tq, S), jnp.float32)

    for h in range(H):                        # static unroll; H is small
        c0 = h * Dp                           # 128-lane-aligned column slice
        qh = q_ref[0, :, c0:c0 + Dp]          # (Tq, Dp) bf16 (scaling folded)
        kh = k_ref[0, :, c0:c0 + Dp]          # (S,  Dp) bf16
        vh = v_ref[0, :, c0:c0 + Dp]          # (S,  Dp) bf16

        s = lax.dot_general(qh, kh, _TRANS_B_DIMS,
                            preferred_element_type=jnp.float32)    # (Tq, S)
        m = jnp.max(s, axis=-1, keepdims=True)
        p = jnp.exp(s - m)                                          # f32 stats
        l = jnp.sum(p, axis=-1, keepdims=True)

        if need_weights:
            # Probabilities are exported: use exact normalization.
            ph = p * pl.reciprocal(l)
            probs_sum = probs_sum + ph
            ctx_h = jnp.dot(ph.astype(bf16), vh,
                            preferred_element_type=jnp.float32)     # (Tq, Dp)
        else:
            # Fold the denominator into the (Tq, Dp) PV result instead of the
            # (Tq, S) probabilities; approx reciprocal runs on the EUP.
            ctx_h = jnp.dot(p.astype(bf16), vh,
                            preferred_element_type=jnp.float32)
            ctx_h = ctx_h * pl.reciprocal(l, approx=True)

        # Every column of ctx is written here, so no zero-init is needed
        # (padded head columns are zero because v's padded columns are zero).
        ctx_ref[:, c0:c0 + Dp] = ctx_h.astype(bf16)

    if need_weights:
        attn_ref[0] = probs_sum * (1.0 / H)

    out = jnp.dot(ctx_ref[...], wo_ref[...],
                  preferred_element_type=jnp.float32) + bo_ref[...]
    out_ref[0] = out.astype(out_ref.dtype)


def _round_up(n, m):
    return ((n + m - 1) // m) * m


def _seq_tile(s):
    # Largest (8,128)-friendly sequence tile; 256 fills the 256-wide MXUs on
    # v6e/v7x (128 may measure better on v5e's 128-wide MXU).
    if s <= 256:
        return s
    for t in (256, 128):
        if s % t == 0:
            return t
    raise ValueError("seq_len must be <= 256 or a multiple of 128")
    # TODO(synk): ragged / non-multiple sequence lengths need a key mask.


def _vmem_limit(nbytes):
    # Budgeted limit + Mosaic-internal headroom, capped at v7x's 64 MiB.
    return int(min(64 * 2**20, max(32 * 2**20, nbytes + 8 * 2**20)))


def multi_head_attention(x, params, num_heads, need_weights=True):
    """Eval-mode forward of the PyTorch MultiHeadAttention module.

    x: (B, S, E) float32; params hold nn.Linear weights in [out, in] layout.
    Returns (output (B, S, E), avg_attn (B, S, S)) when need_weights, else
    (output, None).  No mask; dropout is an inference no-op.
    """
    B, S, E = x.shape
    H = num_heads
    assert E % H == 0
    D = E // H
    scaling = float(D) ** (-0.5)

    Ep = _round_up(E, 128)        # lane-aligned embed dim (x / output columns)
    Dp = _round_up(D, 128)        # lane-aligned per-head dim
    Ei = H * Dp                   # internal q/k/v width (head h at cols h*Dp)

    T = _seq_tile(S)
    n_t = S // T

    f32, bf16 = jnp.float32, jnp.bfloat16

    # --- weight prep: transpose to [in, out], pad each head to 128 lanes ---
    def prep_qkv_w(w, scale=1.0):
        wt = (w.T * scale).reshape(E, H, D)
        wt = jnp.pad(wt, ((0, Ep - E), (0, 0), (0, Dp - D)))
        return wt.reshape(Ep, Ei).astype(bf16)

    def prep_qkv_b(b, scale=1.0):
        bp = jnp.pad((b * scale).reshape(H, D), ((0, 0), (0, Dp - D)))
        return bp.reshape(1, Ei).astype(f32)

    wqkv_t = jnp.concatenate(
        [prep_qkv_w(params['wq'], scaling), prep_qkv_w(params['wk']),
         prep_qkv_w(params['wv'])], axis=1)                         # (Ep, 3*Ei)
    bqkv = jnp.concatenate(
        [prep_qkv_b(params['bq'], scaling), prep_qkv_b(params['bk']),
         prep_qkv_b(params['bv'])], axis=1)                         # (1, 3*Ei)

    wo_t = jnp.pad(params['wo'].T.reshape(H, D, E),
                   ((0, 0), (0, Dp - D), (0, Ep - E))
                   ).reshape(Ei, Ep).astype(bf16)                   # (Ei, Ep)
    bo = jnp.pad(params['bo'], (0, Ep - E)).reshape(1, Ep).astype(f32)

    # x: pad to the lane-aligned embed dim and cast to bf16 once here.
    x_p = jnp.pad(x, ((0, 0), (0, 0), (0, Ep - E))).astype(bf16)

    def const_spec(shape):
        # Resident across the whole grid; single-buffered (never revisited).
        return pl.BlockSpec(shape, lambda b, i: (0,) * len(shape),
                            pipeline_mode=pl.Buffered(1))

    # --- kernel 1: fused QKV projection (computed once per token) ----------
    proj_bytes = (2 * T * Ep * 2                      # x tile (double-buffered)
                  + Ep * 3 * Ei * 2 + 3 * Ei * 4      # weights/bias (single)
                  + 3 * 2 * T * Ei * 2                # q/k/v output tiles
                  + T * 3 * Ei * 4)                   # f32 matmul temporary
    q, k, v = pl.pallas_call(
        functools.partial(_qkv_proj_kernel, e_int=Ei),
        out_shape=tuple(jax.ShapeDtypeStruct((B, S, Ei), bf16) for _ in range(3)),
        grid_spec=pltpu.PrefetchScalarGridSpec(
            num_scalar_prefetch=0,
            grid=(B, n_t),
            in_specs=[
                pl.BlockSpec((1, T, Ep), lambda b, i: (b, i, 0)),
                const_spec((Ep, 3 * Ei)),
                const_spec((1, 3 * Ei)),
            ],
            out_specs=tuple(pl.BlockSpec((1, T, Ei), lambda b, i: (b, i, 0))
                            for _ in range(3)),
        ),
        compiler_params=pltpu.CompilerParams(
            dimension_semantics=("parallel", "parallel"),
            vmem_limit_bytes=_vmem_limit(proj_bytes),
        ),
    )(x_p, wqkv_t, bqkv)

    # --- kernel 2: attention + output projection ----------------------------
    out_shapes = [jax.ShapeDtypeStruct((B, S, Ep), x.dtype)]
    out_specs = [pl.BlockSpec((1, T, Ep), lambda b, qi: (b, qi, 0))]
    if need_weights:
        out_shapes.append(jax.ShapeDtypeStruct((B, S, S), f32))
        out_specs.append(pl.BlockSpec((1, T, S), lambda b, qi: (b, qi, 0)))

    attn_bytes = (2 * T * Ei * 2                      # q tile
                  + 2 * 2 * S * Ei * 2                # k and v (full sequence)
                  + Ei * Ep * 2 + Ep * 4              # Wo^T / bo (single)
                  + 2 * T * Ep * x.dtype.itemsize     # output tile
                  + (2 * T * S * 4 if need_weights else 0)
                  + T * Ei * 2                        # bf16 context scratch
                  + 4 * T * S * 4)                    # f32 score/prob temps
    # TODO(synk): for very long S, stream K/V tiles with an online-softmax
    #             accumulator so VMEM stays O(T * Tk) instead of O(S * Ei).

    res = pl.pallas_call(
        functools.partial(_attn_kernel, num_heads=H, head_dim_p=Dp,
                          need_weights=need_weights),
        out_shape=tuple(out_shapes),
        grid_spec=pltpu.PrefetchScalarGridSpec(
            num_scalar_prefetch=0,
            grid=(B, n_t),
            in_specs=[
                pl.BlockSpec((1, T, Ei), lambda b, qi: (b, qi, 0)),   # q tile
                pl.BlockSpec((1, S, Ei), lambda b, qi: (b, 0, 0)),    # k full S
                pl.BlockSpec((1, S, Ei), lambda b, qi: (b, 0, 0)),    # v full S
                const_spec((Ei, Ep)),                                 # Wo^T
                const_spec((1, Ep)),                                  # bo
            ],
            out_specs=tuple(out_specs),
            scratch_shapes=[pltpu.VMEM((T, Ei), bf16)],               # context
        ),
        compiler_params=pltpu.CompilerParams(
            dimension_semantics=("parallel", "parallel"),
            vmem_limit_bytes=_vmem_limit(attn_bytes),
        ),
    )(q, k, v, wo_t, bo)

    out_p = res[0][:, :, :E]
    attn = res[1] if need_weights else None
    return out_p, attn


def _reference(x, params, num_heads):
    """Pure-JAX reference of the PyTorch forward (eval mode), mirroring the
    kernel's precision policy: bf16 MXU operands, f32 accumulation, f32
    softmax statistics."""
    B, S, E = x.shape
    H = num_heads
    D = E // H
    scaling = float(D) ** (-0.5)
    bf16 = jnp.bfloat16

    def lin(t, w, b):
        return jnp.einsum('bse,eo->bso', t.astype(bf16), w.T.astype(bf16),
                          preferred_element_type=jnp.float32) + b

    def split(t):
        return t.reshape(B, S, H, D).transpose(0, 2, 1, 3)

    q = split(lin(x, params['wq'], params['bq']) * scaling)
    k = split(lin(x, params['wk'], params['bk']))
    v = split(lin(x, params['wv'], params['bv']))
    s = jnp.einsum('bhsd,bhtd->bhst', q.astype(bf16), k.astype(bf16),
                   preferred_element_type=jnp.float32)
    probs = jax.nn.softmax(s, axis=-1)
    ctx = jnp.einsum('bhst,bhtd->bhsd', probs.astype(bf16), v.astype(bf16),
                     preferred_element_type=jnp.float32)
    ctx = ctx.transpose(0, 2, 1, 3).reshape(B, S, E)
    out = jnp.einsum('bse,eo->bso', ctx.astype(bf16),
                     params['wo'].T.astype(bf16),
                     preferred_element_type=jnp.float32) + params['bo']
    return out, probs.mean(axis=1)


if __name__ == "__main__":
    B, S, E, H = 2, 8, 32, 4

    key = jax.random.PRNGKey(0)
    keys = jax.random.split(key, 9)
    init = lambda k, shape: (jax.random.normal(k, shape, jnp.float32)
                             * (1.0 / jnp.sqrt(shape[-1])))
    params = {
        'wq': init(keys[0], (E, E)), 'bq': init(keys[1], (E,)),
        'wk': init(keys[2], (E, E)), 'bk': init(keys[3], (E,)),
        'wv': init(keys[4], (E, E)), 'bv': init(keys[5], (E,)),
        'wo': init(keys[6], (E, E)), 'bo': init(keys[7], (E,)),
    }
    x = jax.random.normal(keys[8], (B, S, E), jnp.float32)

    out, attn = multi_head_attention(x, params, H, need_weights=True)
    out, attn = jax.block_until_ready((out, attn))

    out_nw, _ = multi_head_attention(x, params, H, need_weights=False)
    out_nw = jax.block_until_ready(out_nw)

    ref_out, ref_attn = _reference(x, params, H)

    assert out.shape == (B, S, E) and attn.shape == (B, S, S)
    # Each exported attention row is a probability distribution (exact recip).
    assert jnp.allclose(jnp.sum(attn, axis=-1), 1.0, atol=1e-3)
    assert jnp.allclose(out, ref_out, atol=2e-2, rtol=2e-2), \
        float(jnp.max(jnp.abs(out - ref_out)))
    assert jnp.allclose(attn, ref_attn, atol=1e-2, rtol=1e-2), \
        float(jnp.max(jnp.abs(attn - ref_attn)))
    # need_weights=False path must produce the same output.
    assert jnp.allclose(out_nw, out, atol=2e-2, rtol=2e-2), \
        float(jnp.max(jnp.abs(out_nw - out)))

    print("KERNEL_OK")
</pallas_src>

<mosaic_0001>
module attributes {stable_mosaic.version = 11 : i64} {
  func.func @_qkv_proj_kernel(%arg0: i32, %arg1: i32, %arg2: memref<1x8x128xbf16, #tpu.memory_space<vmem>>, %arg3: memref<128x1536xbf16, #tpu.memory_space<vmem>>, %arg4: memref<1x1536xf32, #tpu.memory_space<vmem>>, %arg5: memref<1x8x512xbf16, #tpu.memory_space<vmem>>, %arg6: memref<1x8x512xbf16, #tpu.memory_space<vmem>>, %arg7: memref<1x8x512xbf16, #tpu.memory_space<vmem>>) attributes {dimension_semantics = [#tpu.dimension_semantics<parallel>, #tpu.dimension_semantics<parallel>], iteration_bounds = array<i64: 2, 1>, scalar_prefetch = 0 : i64, scratch_operands = 0 : i64, tpu.core_type = #tpu.core_type<tc>, window_params = [{transform_indices = @transform_0, window_bounds = array<i64: 1, 8, 128>}, {pipeline_mode = #tpu.pipeline_mode<synchronous>, transform_indices = @transform_1, window_bounds = array<i64: 128, 1536>}, {pipeline_mode = #tpu.pipeline_mode<synchronous>, transform_indices = @transform_2, window_bounds = array<i64: 1, 1536>}, {transform_indices = @transform_3, window_bounds = array<i64: 1, 8, 512>}, {transform_indices = @transform_4, window_bounds = array<i64: 1, 8, 512>}, {transform_indices = @transform_5, window_bounds = array<i64: 1, 8, 512>}]} {
    %c0 = arith.constant 0 : index
    %c0_0 = arith.constant 0 : index
    %c0_1 = arith.constant 0 : index
    %0 = vector.load %arg2[%c0, %c0_0, %c0_1] : memref<1x8x128xbf16, #tpu.memory_space<vmem>>, vector<1x8x128xbf16>
    %1 = vector.shape_cast %0 : vector<1x8x128xbf16> to vector<8x128xbf16>
    %c0_2 = arith.constant 0 : index
    %c0_3 = arith.constant 0 : index
    %2 = vector.load %arg3[%c0_2, %c0_3] : memref<128x1536xbf16, #tpu.memory_space<vmem>>, vector<128x1536xbf16>
    %cst = arith.constant dense<0.000000e+00> : vector<8x1536xf32>
    %3 = tpu.matmul %1, %2, %cst {dimension_numbers = #tpu.dot_dimension_numbers<[1], [0], [0], [1], [0, 0, 1, 1], [], []>} : vector<8x128xbf16>, vector<128x1536xbf16>, vector<8x1536xf32> -> vector<8x1536xf32>
    %c0_4 = arith.constant 0 : index
    %c0_5 = arith.constant 0 : index
    %4 = vector.load %arg4[%c0_4, %c0_5] : memref<1x1536xf32, #tpu.memory_space<vmem>>, vector<1x1536xf32>
    %5 = vector.broadcast %4 : vector<1x1536xf32> to vector<8x1536xf32>
    %6 = arith.addf %3, %5 : vector<8x1536xf32>
    %7 = vector.extract_strided_slice %6 {offsets = [0, 0], sizes = [8, 512], strides = [1, 1]} : vector<8x1536xf32> to vector<8x512xf32>
    %8 = arith.truncf %7 : vector<8x512xf32> to vector<8x512xbf16>
    %c0_6 = arith.constant 0 : index
    %c0_7 = arith.constant 0 : index
    %c0_8 = arith.constant 0 : index
    %9 = vector.load %arg5[%c0_6, %c0_7, %c0_8] : memref<1x8x512xbf16, #tpu.memory_space<vmem>>, vector<1x8x512xbf16>
    %10 = vector.shape_cast %9 : vector<1x8x512xbf16> to vector<8x512xbf16>
    %11 = vector.shape_cast %8 : vector<8x512xbf16> to vector<1x8x512xbf16>
    tpu.vector_store %arg5[%c0_6, %c0_7, %c0_8], %11 {strides = array<i32>} : memref<1x8x512xbf16, #tpu.memory_space<vmem>>, vector<1x8x512xbf16>,
    %12 = vector.extract_strided_slice %6 {offsets = [0, 512], sizes = [8, 512], strides = [1, 1]} : vector<8x1536xf32> to vector<8x512xf32>
    %13 = arith.truncf %12 : vector<8x512xf32> to vector<8x512xbf16>
    %c0_9 = arith.constant 0 : index
    %c0_10 = arith.constant 0 : index
    %c0_11 = arith.constant 0 : index
    %14 = vector.load %arg6[%c0_9, %c0_10, %c0_11] : memref<1x8x512xbf16, #tpu.memory_space<vmem>>, vector<1x8x512xbf16>
    %15 = vector.shape_cast %14 : vector<1x8x512xbf16> to vector<8x512xbf16>
    %16 = vector.shape_cast %13 : vector<8x512xbf16> to vector<1x8x512xbf16>
    tpu.vector_store %arg6[%c0_9, %c0_10, %c0_11], %16 {strides = array<i32>} : memref<1x8x512xbf16, #tpu.memory_space<vmem>>, vector<1x8x512xbf16>,
    %17 = vector.extract_strided_slice %6 {offsets = [0, 1024], sizes = [8, 512], strides = [1, 1]} : vector<8x1536xf32> to vector<8x512xf32>
    %18 = arith.truncf %17 : vector<8x512xf32> to vector<8x512xbf16>
    %c0_12 = arith.constant 0 : index
    %c0_13 = arith.constant 0 : index
    %c0_14 = arith.constant 0 : index
    %19 = vector.load %arg7[%c0_12, %c0_13, %c0_14] : memref<1x8x512xbf16, #tpu.memory_space<vmem>>, vector<1x8x512xbf16>
    %20 = vector.shape_cast %19 : vector<1x8x512xbf16> to vector<8x512xbf16>
    %21 = vector.shape_cast %18 : vector<8x512xbf16> to vector<1x8x512xbf16>
    tpu.vector_store %arg7[%c0_12, %c0_13, %c0_14], %21 {strides = array<i32>} : memref<1x8x512xbf16, #tpu.memory_space<vmem>>, vector<1x8x512xbf16>,
    return
  }
  func.func @transform_0(%arg0: i32, %arg1: i32) -> (i32, i32, i32) {
    %c0_i32 = arith.constant 0 : i32
    %c0_i32_0 = arith.constant 0 : i32
    return %arg0, %arg1, %c0_i32 : i32, i32, i32
  }
  func.func @transform_1(%arg0: i32, %arg1: i32) -> (i32, i32) {
    %c0_i32 = arith.constant 0 : i32
    %c0_i32_0 = arith.constant 0 : i32
    %c0_i32_1 = arith.constant 0 : i32
    return %c0_i32, %c0_i32_0 : i32, i32
  }
  func.func @transform_2(%arg0: i32, %arg1: i32) -> (i32, i32) {
    %c0_i32 = arith.constant 0 : i32
    %c0_i32_0 = arith.constant 0 : i32
    %c0_i32_1 = arith.constant 0 : i32
    return %c0_i32, %c0_i32_0 : i32, i32
  }
  func.func @transform_3(%arg0: i32, %arg1: i32) -> (i32, i32, i32) {
    %c0_i32 = arith.constant 0 : i32
    %c0_i32_0 = arith.constant 0 : i32
    return %arg0, %arg1, %c0_i32 : i32, i32, i32
  }
  func.func @transform_4(%arg0: i32, %arg1: i32) -> (i32, i32, i32) {
    %c0_i32 = arith.constant 0 : i32
    %c0_i32_0 = arith.constant 0 : i32
    return %arg0, %arg1, %c0_i32 : i32, i32, i32
  }
  func.func @transform_5(%arg0: i32, %arg1: i32) -> (i32, i32, i32) {
    %c0_i32 = arith.constant 0 : i32
    %c0_i32_0 = arith.constant 0 : i32
    return %arg0, %arg1, %c0_i32 : i32, i32, i32
  }
}

</mosaic_0001>

<bundles_post_ra>
// kernel: tpu_custom_call.1
= control target key start
LH: loop header
LB: loop body
LE: loop exit
PB: predicated region body
PF: predicated region fallthrough
CT: control target
= control target key end

     0   :  { %11 = vsyncpa [#allocation3], 0  ;;  %s2500_s0 = inlined_call_operand.hbm [shape: bf16[2,8,128], index: 0, kind: input, shape index: {}]   ;;  %s2501_s1 = inlined_call_operand.hbm [shape: bf16[128,1536], index: 1, kind: input, shape index: {}]   ;;  %s2502_s2 = inlined_call_operand.hbm [shape: f32[1,1536], index: 2, kind: input, shape index: {}]   ;;  %s2503_s3 = inlined_call_operand.hbm [shape: bf16[2,8,512], index: 3, kind: output, shape index: {0}]   ;;  %s2504_s4 = inlined_call_operand.hbm [shape: bf16[2,8,512], index: 4, kind: output, shape index: {1}]   ;;  %s2505_s5 = inlined_call_operand.hbm [shape: bf16[2,8,512], index: 5, kind: output, shape index: {2}]  }
   0x1   :  { %13 = vsyncpa [#allocation3 + $0x1], 0 }
   0x2   :  { %14 = vsyncpa [#allocation6], 0 }
   0x3   :  { %15 = vsyncpa [#allocation4], 0 }
   0x4   :  { %17 = vsyncpa [#allocation4 + $0x1], 0 }
   0x5   :  { %18 = vsyncpa [#allocation10], 0 }
   0x6   :  { %20 = vsyncpa [#allocation10 + $0x1], 0  ;;  %s2125_s18 = smov 0   ;;  %s2127_s19 = smov 0  }
   0x7   :  { %s2129_s20 = smov 0   ;;  %s2131_s21 = smov 0  }
   0x8   :  { %s2133_s22 = smov 0   ;;  %s2135_s23 = smov 0  }
   0x9 LB: > { %s2156_s24 = sadd.s32 4294967295, %s2084_s23   ;;  %s1476_s25 = sadd.s32 4294967294, %s2084_s23   ;;  %s2084_s23 = sphi %s2135_s23, %s26_s23   ;;  %s2080_s22 = sphi %s2133_s22, %s2526_s22   ;;  %s2076_s21 = sphi %s2131_s21, %s2525_s21   ;;  %s2072_s20 = sphi %s2129_s20, %s2524_s20   ;;  %s2068_s19 = sphi %s2127_s19, %s2523_s19   ;;  %s2064_s18 = sphi %s2125_s18, %s2522_s18  }
   0xa   : > { %p60_p0 = scmp.ne.s32.totalorder %s2068_s19, %s2064_s18  ;;  %p2506_p1 = scmp.eq.s32.totalorder %s2156_s24, 0 }
   0xb   : > { %p134_p3 = scmp.eq.s32.totalorder %s1476_s25, 1  ;;  %p1477_p5 = scmp.ge.s32.totalorder %s2084_s23, 1 }
   0xc   : > { %p2167_p4 = por %p2506_p1, %p60_p0  ;;  %p197_p7 = scmp.lt.s32.totalorder %s2084_s23, 3 }
   0xd   : > { %p2172_p6 = por %p134_p3, %p60_p0  ;;  %s2086_s29 = smov [#allocation5]  }
   0xe   : > { %s2509_s26 = scalar_select %p2167_p4, 1, 0 }
   0xf   : > { %s2510_s27 = scalar_select %p2172_p6, 1, 0 }
  0x10   : > { %p2177_p8 = pnand %p1477_p5, %p197_p7  ;;  %s209_s30 = sshll.u32 %s2086_s29, 4  ;;  %s2181_s30 = int_to_ptr.vmem [resolvable:$true] %s209_s30 }
  0x11   : > { %s2087_s7 = smov [#allocation7]   ;;  %s1852_s11 = scalar_lea.hbm %s2501_s1, 12288 }
  0x12   : > { %p1628_p9 = pneg %p2177_p8  ;;  %s223_s8 = sshll.u32 %s2087_s7, 4  ;;  %s2192_s8 = int_to_ptr.vmem [resolvable:$true] %s223_s8 }
  0x13   : > { %p1853_p12 = scmp.ne.s32.totalorder %s2501_s1, %s1852_s11  ;;  %p1859_p5 = scmp.lt.u32.totalorder %s1852_s11, %s2501_s1 }
  0x14   : > { %p2188_p11 = pnand %p1628_p9, %p2506_p1 }
  0x16   : > { %p1854_p13 = pneg %p2188_p11 }
  0x18   : > { %p1855_p0 = pnand %p1854_p13, %p1853_p12 }
  0x1a   : > { %p1856_p3 = pneg %p1855_p0 }
  0x1c   : > { %p1861_p7 = pnand %p1859_p5, %p1856_p3 }
  0x1e   : > { %1864 = shalt.err (!%p1861_p7)
}
  0x1f   : > { %s1865_s16 = scalar_lea.vmem %s2181_s30, 12288  ;;  %p1873_p2 = scmp.lt.s32.totalorder %s2181_s30, %s2181_s30 }
  0x20   : > { %p1866_p9 = scmp.ne.s32.totalorder %s2181_s30, %s1865_s16  ;;  %p1874_p12 = scmp.lt.s32.totalorder %s1865_s16, %s1865_s16 }
  0x22   : > { %p1868_p10 = pnand %p1866_p9, %p1854_p13  ;;  %p1875_p0 = por %p1874_p12, %p1873_p2 }
  0x24   : > { %p1869_p1 = pneg %p1868_p10 }
  0x26   : > { %p1876_p6 = pnand %p1875_p0, %p1869_p1 }
  0x28   : > { %1879 = shalt.err (!%p1876_p6)
}
  0x29   : > { %s2088_s17 = smov 768   ;;  %s2089_s29 = smov 48  }
  0x2a   : > { %1631 = dma.hbm_to_vmem [thread:$0]  (!%p2188_p11), %s2501_s1, 12288, %s2181_s30, [#allocation6], %s2088_s17, %s2088_s17, %s2089_s29  }
  0x2b   : > { %s1880_s12 = scalar_lea.hbm %s2502_s2, 192 }
  0x2c   : > { %p1881_p2 = scmp.ne.s32.totalorder %s2502_s2, %s1880_s12  ;;  %p1887_p10 = scmp.lt.u32.totalorder %s1880_s12, %s2502_s2 }
  0x2e   : > { %p1883_p1 = pnand %p1881_p2, %p1854_p13 }
  0x30   : > { %p1884_p6 = pneg %p1883_p1 }
  0x32   : > { %p1889_p3 = pnand %p1887_p10, %p1884_p6 }
  0x34   : > { %1892 = shalt.err (!%p1889_p3)
}
  0x35   : > { %s1893_s30 = scalar_lea.vmem %s2192_s8, 192  ;;  %p1901_p12 = scmp.lt.s32.totalorder %s2192_s8, %s2192_s8 }
  0x36   : > { %p1894_p5 = scmp.ne.s32.totalorder %s2192_s8, %s1893_s30  ;;  %p1902_p0 = scmp.lt.s32.totalorder %s1893_s30, %s1893_s30 }
  0x38   : > { %p1896_p7 = pnand %p1894_p5, %p1854_p13  ;;  %p1903_p2 = por %p1902_p0, %p1901_p12 }
  0x3a   : > { %p1897_p9 = pneg %p1896_p7 }
  0x3c   : > { %p1904_p1 = pnand %p1903_p2, %p1897_p9 }
  0x3e   : > { %1907 = shalt.err (!%p1904_p1)
}
  0x3f   : > { %1634 = dma.hbm_to_vmem [thread:$0]  (!%p2188_p11), %s2502_s2, 192, %s2192_s8, [#allocation6]  }
  0x40   : > { %s38_s7 = sadd.s32 1, %s2080_s22  ;;  %s47_s9 = sadd.s32 1, %s2072_s20 }
  0x41   : > { %p40_p13 = scmp.ge.s32.totalorder %s38_s7, 2  ;;  %p54_p6 = scmp.ne.s32.totalorder %s2072_s20, %s2068_s19 }
  0x42   : > { %p55_p10 = scmp.eq.s32.totalorder %s2084_s23, 0  ;;  %p1651_p3 = scmp.lt.s32.totalorder %s2084_s23, 2 }
  0x43   : > { %s2528_s7 = smov (%p40_p13, %s38_s7), 0  ;;  %p2513_p7 = scmp.eq.s32.totalorder %s2156_s24, 1 }
  0x44   : > { %p56_p5 = por %p55_p10, %p54_p6  ;;  %s42_s10 = ssub.s32 %s2080_s22, %s2528_s7 }
  0x45   : > { %p2256_p9 = por %p2513_p7, %p54_p6  ;;  %s234_s11 = sand.u32 1, %s2072_s20  }
  0x46   : > { %p45_p12 = scmp.eq.s32.totalorder %s42_s10, 0  ;;  %s1481_s8 = sshll.u32 %s234_s11, 2 }
  0x47   : > { %s2514_s6 = scalar_select %p2256_p9, 1, 0 }
  0x48   : > { %s1482_s12 = sshll.u32 %s2080_s22, 6  ;;  %s238_s30 = scalar_lea.vmem [#allocation2], %s1481_s8 }
  0x49   : > { %s2265_s13 = scalar_select %p45_p12, %s2072_s20, %s47_s9  }
  0x4a   : > { %s2270_s16 = scalar_lea.hbm %s2500_s0, %s1482_s12  ;;  %s246_s17 = sshll.u32 %s238_s30, 4  ;;  %s2278_s17 = int_to_ptr.vmem [resolvable:$true] %s246_s17 }
  0x4b   : > { %p2274_p11 = pnand %p1651_p3, %p56_p5  ;;  %s235_s9 = scalar_lea.sflag [#allocation3], %s234_s11 }
  0x4c   : > { %s1908_s10 = scalar_lea.hbm %s2270_s16, 64  ;;  %s1913_s14 = scalar_lea.hbm %s2500_s0, 128 }
  0x4d   : > { %p1909_p0 = scmp.ne.s32.totalorder %s2270_s16, %s1908_s10  ;;  %p1910_p2 = pneg %p2274_p11 }
  0x4e   : > { %p1914_p6 = scmp.lt.u32.totalorder %s2270_s16, %s2500_s0  ;;  %p1915_p10 = scmp.lt.u32.totalorder %s1913_s14, %s1908_s10 }
  0x4f   : > { %p1911_p1 = pnand %p1910_p2, %p1909_p0  ;;  %p1917_p5 = scmp.lt.u32.totalorder %s1908_s10, %s2270_s16 }
  0x50   : > { %p1916_p3 = por %p1915_p10, %p1914_p6 }
  0x51   : > { %p1912_p13 = pneg %p1911_p1 }
  0x52   : > { %p1918_p7 = por %p1917_p5, %p1916_p3 }
  0x54   : > { %p1919_p12 = pnand %p1918_p7, %p1912_p13 }
  0x56   : > { %1922 = shalt.err (!%p1919_p12)
}
  0x57   : > { %s1923_s11 = scalar_lea.vmem %s2278_s17, 64  ;;  %s2090_s8 = smov [#allocation2]  }
  0x58   : > { %p1924_p0 = scmp.ne.s32.totalorder %s2278_s17, %s1923_s11  ;;  %s1928_s12 = sshll.u32 %s2090_s8, 4  ;;  %s1929_s12 = int_to_ptr.vmem [resolvable:$false] %s1928_s12 }
  0x59   : > { %s1930_s15 = scalar_lea.vmem %s1929_s12, 128  ;;  %p1931_p4 = scmp.lt.s32.totalorder %s2278_s17, %s1929_s12 }
  0x5a   : > { %p1926_p1 = pnand %p1924_p0, %p1910_p2  ;;  %p1932_p6 = scmp.lt.s32.totalorder %s1930_s15, %s1923_s11 }
  0x5c   : > { %p1927_p9 = pneg %p1926_p1  ;;  %p1933_p10 = por %p1932_p6, %p1931_p4 }
  0x5e   : > { %p1934_p3 = pnand %p1933_p10, %p1927_p9 }
  0x60   : > { %1937 = shalt.err (!%p1934_p3)
}
  0x61   : > { %1638 = dma.hbm_to_vmem [thread:$0]  (!%p2274_p11), %s2270_s16, 64, %s2278_s17, %s235_s9  }
  0x62   : > { %255 = sbr.rel (%p2177_p8) target bundleno = 438 (0x1b6), region = 32  ;;  %s2308_s10 = sand.u32 (!%p2177_p8), 1, %s2068_s19  }
  0x63   : > { %s1484_s14 = sshll.u32 (!%p2177_p8), %s2308_s10, 2  ;;  %s258_s30 = scalar_lea.sflag (!%p2177_p8), [#allocation3], %s2308_s10 }
  0x64   : > { %s2312_s11 = scalar_lea.vmem (!%p2177_p8), [#allocation2], %s1484_s14  ;;  %p2516_p4 = scmp.ne.s32.totalorder (!%p2177_p8), %s2509_s26, 0 }
  0x69   : > { %2047 = dma.done.wait (%p2516_p4), %s258_s30, 64  }
  0x6a   : > { %2049 = vsyncadd (%p2516_p4), %s258_s30, 4294967232  ;;  %p2517_p9 = scmp.eq.s32.totalorder %s2156_s24, 0 }
  0x6c   : > { %2051 = dma.done.wait (%p2517_p9), [#allocation6], 12480   ;;  %p2518_p8 = pmov %p2517_p9 }
  0x6d   : > { %v2091_v0 = vmov 0   ;;  %v1708_v1 = vld [vmem:[#allocation5 + $0x4] ss:$48 sps:$4 sm:$0xff]   ;;  %v1710_v2 = vld [vmem:[#allocation5 + $0xc] ss:$48 sps:$4 sm:$0xff]   ;;  %s2352_s26 = sshll.u32 %s2308_s10, 4 }
  0x6e   : > { %2053 = vsyncadd (%p2518_p8), [#allocation6], 4294954816  ;;  %980 = vmatprep.mubr.bf16.mxu0 %v2091_v0  ;;  %1021 = vmatprep.mubr.bf16.mxu1 %v2091_v0  ;;  %v1712_v3 = vld [vmem:[#allocation5] ss:$48 sps:$4 sm:$0xff]   ;;  %v1713_v4 = vld [vmem:[#allocation5 + $0x8] ss:$48 sps:$4 sm:$0xff]  }
  0x6f   : > { %948 = vmatprep.subr.bf16.mxu0 %v1708_v1  ;;  %989 = vmatprep.subr.bf16.mxu1 %v1710_v2  ;;  %v1714_v5 = vld [vmem:[#allocation5 + $0x64] ss:$48 sps:$4 sm:$0xff]   ;;  %v1716_v6 = vld [vmem:[#allocation5 + $0x6c] ss:$48 sps:$4 sm:$0xff]   ;;  %v1718_v7 = vld [vmem:[#allocation5 + $0x60] ss:$48 sps:$4 sm:$0xff]  }
  0x70   : > { %949 = vmatpush1.bf16.msra.mxu0 %v1712_v3  ;;  %990 = vmatpush1.bf16.msra.mxu1 %v1713_v4  ;;  %v1719_v8 = vld [vmem:[#allocation5 + $0x68] ss:$48 sps:$4 sm:$0xff]   ;;  %v1720_v9 = vld [vmem:[#allocation5 + $0xc4] ss:$48 sps:$4 sm:$0xff]   ;;  %v1722_v10 = vld [vmem:[#allocation5 + $0xcc] ss:$48 sps:$4 sm:$0xff]  }
  0x71   : > { %950 = vmatprep.subr.bf16.mxu0 %v1714_v5  ;;  %991 = vmatprep.subr.bf16.mxu1 %v1716_v6  ;;  %v1724_v11 = vld [vmem:[#allocation5 + $0xc0] ss:$48 sps:$4 sm:$0xff]   ;;  %v1725_v12 = vld [vmem:[#allocation5 + $0xc8] ss:$48 sps:$4 sm:$0xff]   ;;  %v1726_v13 = vld [vmem:[#allocation5 + $0x124] ss:$48 sps:$4 sm:$0xff]  }
  0x72   : > { %v1728_v14 = vld [vmem:[#allocation5 + $0x12c] ss:$48 sps:$4 sm:$0xff]   ;;  %v1730_v15 = vld [vmem:[#allocation5 + $0x120] ss:$48 sps:$4 sm:$0xff]   ;;  %v1731_v16 = vld [vmem:[#allocation5 + $0x128] ss:$48 sps:$4 sm:$0xff]  }
  0x73   : > { %v1732_v17 = vld [vmem:[#allocation5 + $0x184] ss:$48 sps:$4 sm:$0xff]   ;;  %v1734_v18 = vld [vmem:[#allocation5 + $0x18c] ss:$48 sps:$4 sm:$0xff]   ;;  %v1736_v19 = vld [vmem:[#allocation5 + $0x180] ss:$48 sps:$4 sm:$0xff]  }
  0x74   : > { %951 = vmatpush1.bf16.msra.mxu0 %v1718_v7  ;;  %992 = vmatpush1.bf16.msra.mxu1 %v1719_v8  ;;  %v1737_v20 = vld [vmem:[#allocation5 + $0x188] ss:$48 sps:$4 sm:$0xff]   ;;  %v1738_v21 = vld [vmem:[#allocation5 + $0x1e4] ss:$48 sps:$4 sm:$0xff]   ;;  %v1740_v22 = vld [vmem:[#allocation5 + $0x1ec] ss:$48 sps:$4 sm:$0xff]  }
  0x75   : > { %952 = vmatprep.subr.bf16.mxu0 %v1720_v9  ;;  %993 = vmatprep.subr.bf16.mxu1 %v1722_v10  ;;  %v1742_v23 = vld [vmem:[#allocation5 + $0x1e0] ss:$48 sps:$4 sm:$0xff]   ;;  %v1743_v24 = vld [vmem:[#allocation5 + $0x1e8] ss:$48 sps:$4 sm:$0xff]   ;;  %v1744_v25 = vld [vmem:[#allocation5 + $0x244] ss:$48 sps:$4 sm:$0xff]  }
  0x76   : > { %v1746_v26 = vld [vmem:[#allocation5 + $0x24c] ss:$48 sps:$4 sm:$0xff]   ;;  %v1748_v27 = vld [vmem:[#allocation5 + $0x240] ss:$48 sps:$4 sm:$0xff]   ;;  %v1749_v28 = vld [vmem:[#allocation5 + $0x248] ss:$48 sps:$4 sm:$0xff]  }
  0x77   : > { %v1750_v29 = vld [vmem:[#allocation5 + $0x2a4] ss:$48 sps:$4 sm:$0xff]   ;;  %v1752_v30 = vld [vmem:[#allocation5 + $0x2ac] ss:$48 sps:$4 sm:$0xff]   ;;  %v1754_v31 = vld [vmem:[#allocation5 + $0x2a0] ss:$48 sps:$4 sm:$0xff]  }
  0x78   : > { %953 = vmatpush1.bf16.msra.mxu0 %v1724_v11  ;;  %994 = vmatpush1.bf16.msra.mxu1 %v1725_v12  ;;  %v1755_v32 = vld [vmem:[#allocation5 + $0x2a8] ss:$48 sps:$4 sm:$0xff]   ;;  %v1758_v33 = vld [vmem:[#allocation5 + $0x14] ss:$48 sps:$4 sm:$0xff]   ;;  %v1761_v34 = vld [vmem:[#allocation5 + $0x1c] ss:$48 sps:$4 sm:$0xff]  }
  0x79   : > { %954 = vmatprep.subr.bf16.mxu0 %v1726_v13  ;;  %995 = vmatprep.subr.bf16.mxu1 %v1728_v14  ;;  %v2325_v35 = vld [vmem:[%s2312_s11] sm:$0xf]  ;;  %v1756_v36 = vld [vmem:[#allocation5 + $0x10] ss:$48 sps:$4 sm:$0xff]   ;;  %v1764_v38 = vld [vmem:[#allocation5 + $0x74] ss:$48 sps:$4 sm:$0xff]  }
  0x7a   : > { %v1759_v37 = vld [vmem:[#allocation5 + $0x18] ss:$48 sps:$4 sm:$0xff]   ;;  %v1767_v39 = vld [vmem:[#allocation5 + $0x7c] ss:$48 sps:$4 sm:$0xff]   ;;  %v1762_v40 = vld [vmem:[#allocation5 + $0x70] ss:$48 sps:$4 sm:$0xff]  }
  0x7b   : > { %v1765_v41 = vld [vmem:[#allocation5 + $0x78] ss:$48 sps:$4 sm:$0xff]   ;;  %v1770_v42 = vld [vmem:[#allocation5 + $0xd4] ss:$48 sps:$4 sm:$0xff]   ;;  %v1773_v43 = vld [vmem:[#allocation5 + $0xdc] ss:$48 sps:$4 sm:$0xff]  }
  0x7c   : > { %955 = vmatpush1.bf16.msra.mxu0 %v1730_v15  ;;  %996 = vmatpush1.bf16.msra.mxu1 %v1731_v16  ;;  %v1768_v44 = vld [vmem:[#allocation5 + $0xd0] ss:$48 sps:$4 sm:$0xff]   ;;  %v1771_v45 = vld [vmem:[#allocation5 + $0xd8] ss:$48 sps:$4 sm:$0xff]   ;;  %v1776_v46 = vld [vmem:[#allocation5 + $0x134] ss:$48 sps:$4 sm:$0xff]  }
  0x7d   : > { %956 = vmatprep.subr.bf16.mxu0 %v1732_v17  ;;  %997 = vmatprep.subr.bf16.mxu1 %v1734_v18  ;;  %v1779_v47 = vld [vmem:[#allocation5 + $0x13c] ss:$48 sps:$4 sm:$0xff]   ;;  %v1774_v48 = vld [vmem:[#allocation5 + $0x130] ss:$48 sps:$4 sm:$0xff]   ;;  %v1777_v49 = vld [vmem:[#allocation5 + $0x138] ss:$48 sps:$4 sm:$0xff]  }
  0x7e   : > { %v1782_v50 = vld [vmem:[#allocation5 + $0x194] ss:$48 sps:$4 sm:$0xff]   ;;  %v1785_v51 = vld [vmem:[#allocation5 + $0x19c] ss:$48 sps:$4 sm:$0xff]   ;;  %v1780_v52 = vld [vmem:[#allocation5 + $0x190] ss:$48 sps:$4 sm:$0xff]  }
  0x7f   : > { %v1783_v53 = vld [vmem:[#allocation5 + $0x198] ss:$48 sps:$4 sm:$0xff]   ;;  %v1788_v54 = vld [vmem:[#allocation5 + $0x1f4] ss:$48 sps:$4 sm:$0xff]   ;;  %v1791_v55 = vld [vmem:[#allocation5 + $0x1fc] ss:$48 sps:$4 sm:$0xff]  }
  0x80   : > { %957 = vmatpush1.bf16.msra.mxu0 %v1736_v19  ;;  %998 = vmatpush1.bf16.msra.mxu1 %v1737_v20  ;;  %v1786_v56 = vld [vmem:[#allocation5 + $0x1f0] ss:$48 sps:$4 sm:$0xff]   ;;  %v1789_v57 = vld [vmem:[#allocation5 + $0x1f8] ss:$48 sps:$4 sm:$0xff]   ;;  %v1794_v58 = vld [vmem:[#allocation5 + $0x254] ss:$48 sps:$4 sm:$0xff]  }
  0x81   : > { %958 = vmatprep.subr.bf16.mxu0 %v1738_v21  ;;  %999 = vmatprep.subr.bf16.mxu1 %v1740_v22  ;;  %v1797_v59 = vld [vmem:[#allocation5 + $0x25c] ss:$48 sps:$4 sm:$0xff]   ;;  %v1792_v60 = vld [vmem:[#allocation5 + $0x250] ss:$48 sps:$4 sm:$0xff]   ;;  %v1795_v61 = vld [vmem:[#allocation5 + $0x258] ss:$48 sps:$4 sm:$0xff]  }
  0x82   : > { %v1800_v62 = vld [vmem:[#allocation5 + $0x2b4] ss:$48 sps:$4 sm:$0xff]   ;;  %v1803_v63 = vld [vmem:[#allocation5 + $0x2bc] ss:$48 sps:$4 sm:$0xff]   ;;  %v1798_v1 = vld [vmem:[#allocation5 + $0x2b0] ss:$48 sps:$4 sm:$0xff]  }
  0x83   : > { %v1801_v2 = vld [vmem:[#allocation5 + $0x2b8] ss:$48 sps:$4 sm:$0xff]   ;;  %v1806_v3 = vld [vmem:[#allocation5 + $0x24] ss:$48 sps:$4 sm:$0xff]   ;;  %v1809_v4 = vld [vmem:[#allocation5 + $0x2c] ss:$48 sps:$4 sm:$0xff]  }
  0x84   : > { %959 = vmatpush1.bf16.msra.mxu0 %v1742_v23  ;;  %1000 = vmatpush1.bf16.msra.mxu1 %v1743_v24  ;;  %v1804_v5 = vld [vmem:[#allocation5 + $0x20] ss:$48 sps:$4 sm:$0xff]   ;;  %v1807_v6 = vld [vmem:[#allocation5 + $0x28] ss:$48 sps:$4 sm:$0xff]   ;;  %v1812_v7 = vld [vmem:[#allocation5 + $0x84] ss:$48 sps:$4 sm:$0xff]  }
  0x85   : > { %960 = vmatprep.subr.bf16.mxu0 %v1744_v25  ;;  %1001 = vmatprep.subr.bf16.mxu1 %v1746_v26  ;;  %v1815_v8 = vld [vmem:[#allocation5 + $0x8c] ss:$48 sps:$4 sm:$0xff]   ;;  %v1810_v9 = vld [vmem:[#allocation5 + $0x80] ss:$48 sps:$4 sm:$0xff]   ;;  %v1813_v10 = vld [vmem:[#allocation5 + $0x88] ss:$48 sps:$4 sm:$0xff]  }
  0x86   : > { %v1818_v11 = vld [vmem:[#allocation5 + $0xe4] ss:$48 sps:$4 sm:$0xff]   ;;  %v1821_v12 = vld [vmem:[#allocation5 + $0xec] ss:$48 sps:$4 sm:$0xff]   ;;  %v1816_v13 = vld [vmem:[#allocation5 + $0xe0] ss:$48 sps:$4 sm:$0xff]  }
  0x87   : > { %v1819_v14 = vld [vmem:[#allocation5 + $0xe8] ss:$48 sps:$4 sm:$0xff]   ;;  %v1824_v15 = vld [vmem:[#allocation5 + $0x144] ss:$48 sps:$4 sm:$0xff]   ;;  %v1827_v16 = vld [vmem:[#allocation5 + $0x14c] ss:$48 sps:$4 sm:$0xff]  }
  0x88   : > { %961 = vmatpush1.bf16.msra.mxu0 %v1748_v27  ;;  %1002 = vmatpush1.bf16.msra.mxu1 %v1749_v28  ;;  %v1822_v17 = vld [vmem:[#allocation5 + $0x140] ss:$48 sps:$4 sm:$0xff]   ;;  %v1825_v18 = vld [vmem:[#allocation5 + $0x148] ss:$48 sps:$4 sm:$0xff]   ;;  %v1830_v19 = vld [vmem:[#allocation5 + $0x1a4] ss:$48 sps:$4 sm:$0xff]  }
  0x89   : > { %962 = vmatprep.subr.bf16.mxu0 %v1750_v29  ;;  %1003 = vmatprep.subr.bf16.mxu1 %v1752_v30  ;;  %v1833_v20 = vld [vmem:[#allocation5 + $0x1ac] ss:$48 sps:$4 sm:$0xff]   ;;  %v1828_v21 = vld [vmem:[#allocation5 + $0x1a0] ss:$48 sps:$4 sm:$0xff]   ;;  %v1836_v22 = vld [vmem:[#allocation5 + $0x204] ss:$48 sps:$4 sm:$0xff]  }
  0x8a   : > { %v1839_v23 = vld [vmem:[#allocation5 + $0x20c] ss:$48 sps:$4 sm:$0xff]   ;;  %v1834_v24 = vld [vmem:[#allocation5 + $0x200] ss:$48 sps:$4 sm:$0xff]   ;;  %v1837_v25 = vld [vmem:[#allocation5 + $0x208] ss:$48 sps:$4 sm:$0xff]  }
  0x8b   : > { %v1842_v26 = vld [vmem:[#allocation5 + $0x264] ss:$48 sps:$4 sm:$0xff]   ;;  %v1845_v27 = vld [vmem:[#allocation5 + $0x26c] ss:$48 sps:$4 sm:$0xff]   ;;  %v1840_v28 = vld [vmem:[#allocation5 + $0x260] ss:$48 sps:$4 sm:$0xff]  }
  0x8c   : > { %963 = vmatpush1.bf16.msra.mxu0 %v1754_v31  ;;  %1004 = vmatpush1.bf16.msra.mxu1 %v1755_v32  ;;  %v1843_v29 = vld [vmem:[#allocation5 + $0x268] ss:$48 sps:$4 sm:$0xff]   ;;  %v1848_v30 = vld [vmem:[#allocation5 + $0x2c4] ss:$48 sps:$4 sm:$0xff]   ;;  %v1851_v31 = vld [vmem:[#allocation5 + $0x2cc] ss:$48 sps:$4 sm:$0xff]  }
  0x8d   : > { %1030 = vmatprep.subr.bf16.mxu0 %v1758_v33  ;;  %1071 = vmatprep.subr.bf16.mxu1 %v1761_v34  ;;  %v1846_v32 = vld [vmem:[#allocation5 + $0x2c0] ss:$48 sps:$4 sm:$0xff]   ;;  %v1849_v33 = vld [vmem:[#allocation5 + $0x2c8] ss:$48 sps:$4 sm:$0xff]   ;;  %v408_v34 = vlaneseq  ;;  %s2361_s28 = sshll.u32 %s2076_s21, 8  ;;  %s291_s16 = scalar_lea.vmem [#allocation8], %s2352_s26 }
  0x8e   : > { %s1275_s17 = sshll.u32 %s291_s16, 4  ;;  %s2368_s8 = scalar_lea.hbm %s2503_s3, %s2361_s28  ;;  %s2370_s17 = int_to_ptr.vmem [resolvable:$true] %s1275_s17 }
  0x8f   : > { %981 = vmatmul.mubr.bf16.vlgmr.msra.gmra.mrb[0].mxu0 %v2325_v35  ;;  %1022 = vmatmul.mubr.bf16.vlgmr.msra.gmra.mrb[0].mxu1 %v2325_v35  ;;  %s1249_s21 = scalar_lea.sflag [#allocation4], %s2308_s10  ;;  %s1938_s12 = scalar_lea.vmem %s2370_s17, 256 }
  0x90   : > { %1031 = vmatpush1.bf16.msra.mxu0 %v1756_v36  ;;  %1072 = vmatpush1.bf16.msra.mxu1 %v1759_v37  ;;  %v2337_v36 = vshrl.u32 %v408_v34, 7  ;;  %p1939_p11 = scmp.ne.s32.totalorder %s2370_s17, %s1938_s12  ;;  %p2519_p2 = scmp.ne.s32.totalorder %s2514_s6, 0 }
  0x91   : > { %1032 = vmatprep.subr.bf16.mxu0 %v1764_v38  ;;  %1073 = vmatprep.subr.bf16.mxu1 %v1767_v39  ;;  %v2341_v39 = vld [vmem:[#allocation7] sm:$0xff]  ;;  %s2092_s15 = smov [#allocation8]  }
  0x92   : > { %1062 = vmatprep.mubr.bf16.mxu0 %v2091_v0  ;;  %1103 = vmatprep.mubr.bf16.mxu1 %v2091_v0  ;;  %v410_v37 = vsub.s32 0, %v2337_v36  ;;  %v418_v38 = vsub.s32 2, %v2337_v36  ;;  %p1940_p13 = pnand %p1939_p11, %p2519_p2  ;;  %s1942_s14 = sshll.u32 %s2092_s15, 4  ;;  %s1943_s14 = int_to_ptr.vmem [resolvable:$false] %s1942_s14 }
  0x93   : > { %s1944_s30 = scalar_lea.vmem %s1943_s14, 512  ;;  %p1945_p7 = scmp.lt.s32.totalorder %s2370_s17, %s1943_s14 }
  0x94   : > { %1033 = vmatpush1.bf16.msra.mxu0 %v1762_v40  ;;  %1074 = vmatpush1.bf16.msra.mxu1 %v1765_v41  ;;  %v414_v40 = vsub.s32 1, %v2337_v36  ;;  %v422_v41 = vsub.s32 3, %v2337_v36  ;;  %p1941_p5 = pneg %p1940_p13  ;;  %p1946_p12 = scmp.lt.s32.totalorder %s1944_s30, %s1938_s12 }
  0x95   : > { %1034 = vmatprep.subr.bf16.mxu0 %v1770_v42  ;;  %1075 = vmatprep.subr.bf16.mxu1 %v1773_v43  ;;  %v411_v42 = vrot.slane %v2341_v39, %v410_v37 }
  0x96   : > { %v415_v43 = vrot.slane %v2341_v39, %v414_v40  ;;  %p1947_p0 = por %p1946_p12, %p1945_p7 }
  0x98   : > { %1035 = vmatpush1.bf16.msra.mxu0 %v1768_v44  ;;  %1076 = vmatpush1.bf16.msra.mxu1 %v1771_v45  ;;  %v423_v44 = vrot.slane %v2341_v39, %v422_v41  ;;  %p1948_p1 = pnand %p1947_p0, %p1941_p5 }
  0x99   : > { %1036 = vmatprep.subr.bf16.mxu0 %v1776_v46  ;;  %1077 = vmatprep.subr.bf16.mxu1 %v1779_v47 }
  0x9c   : > { %1037 = vmatpush1.bf16.msra.mxu0 %v1774_v48  ;;  %1078 = vmatpush1.bf16.msra.mxu1 %v1777_v49 }
  0x9d   : > { %1038 = vmatprep.subr.bf16.mxu0 %v1782_v50  ;;  %1079 = vmatprep.subr.bf16.mxu1 %v1785_v51 }
  0xa0   : > { %1039 = vmatpush1.bf16.msra.mxu0 %v1780_v52  ;;  %1080 = vmatpush1.bf16.msra.mxu1 %v1783_v53 }
  0xa1   : > { %1040 = vmatprep.subr.bf16.mxu0 %v1788_v54  ;;  %1081 = vmatprep.subr.bf16.mxu1 %v1791_v55 }
  0xa4   : > { %1041 = vmatpush1.bf16.msra.mxu0 %v1786_v56  ;;  %1082 = vmatpush1.bf16.msra.mxu1 %v1789_v57 }
  0xa5   : > { %1042 = vmatprep.subr.bf16.mxu0 %v1794_v58  ;;  %1083 = vmatprep.subr.bf16.mxu1 %v1797_v59 }
  0xa8   : > { %1043 = vmatpush1.bf16.msra.mxu0 %v1792_v60  ;;  %1084 = vmatpush1.bf16.msra.mxu1 %v1795_v61 }
  0xa9   : > { %1044 = vmatprep.subr.bf16.mxu0 %v1800_v62  ;;  %1085 = vmatprep.subr.bf16.mxu1 %v1803_v63 }
  0xac   : > { %1045 = vmatpush1.bf16.msra.mxu0 %v1798_v1  ;;  %1086 = vmatpush1.bf16.msra.mxu1 %v1801_v2 }
  0xad   : > { %1112 = vmatprep.subr.bf16.mxu0 %v1806_v3  ;;  %1153 = vmatprep.subr.bf16.mxu1 %v1809_v4 }
  0xaf   : > { %1063 = vmatmul.mubr.bf16.vlgmr.msra.gmra.mrb[4].mxu0 %v2325_v35  ;;  %1104 = vmatmul.mubr.bf16.vlgmr.msra.gmra.mrb[4].mxu1 %v2325_v35 }
  0xb0   : > { %1113 = vmatpush1.bf16.msra.mxu0 %v1804_v5  ;;  %1154 = vmatpush1.bf16.msra.mxu1 %v1807_v6 }
  0xb1   : > { %1114 = vmatprep.subr.bf16.mxu0 %v1812_v7  ;;  %1155 = vmatprep.subr.bf16.mxu1 %v1815_v8 }
  0xb2   : > { %1144 = vmatprep.mubr.bf16.mxu0 %v2091_v0  ;;  %1185 = vmatprep.mubr.bf16.mxu1 %v2091_v0  ;;  %v1831_v0 = vld [vmem:[#allocation5 + $0x1a8] ss:$48 sps:$4 sm:$0xff]  }
  0xb4   : > { %1115 = vmatpush1.bf16.msra.mxu0 %v1810_v9  ;;  %1156 = vmatpush1.bf16.msra.mxu1 %v1813_v10 }
  0xb5   : > { %1116 = vmatprep.subr.bf16.mxu0 %v1818_v11  ;;  %1157 = vmatprep.subr.bf16.mxu1 %v1821_v12 }
  0xb8   : > { %1117 = vmatpush1.bf16.msra.mxu0 %v1816_v13  ;;  %1158 = vmatpush1.bf16.msra.mxu1 %v1819_v14 }
  0xb9   : > { %1118 = vmatprep.subr.bf16.mxu0 %v1824_v15  ;;  %1159 = vmatprep.subr.bf16.mxu1 %v1827_v16 }
  0xbc   : > { %1119 = vmatpush1.bf16.msra.mxu0 %v1822_v17  ;;  %1160 = vmatpush1.bf16.msra.mxu1 %v1825_v18 }
  0xbd   : > { %1120 = vmatprep.subr.bf16.mxu0 %v1830_v19  ;;  %1161 = vmatprep.subr.bf16.mxu1 %v1833_v20 }
  0xc0   : > { %1121 = vmatpush1.bf16.msra.mxu0 %v1828_v21  ;;  %1162 = vmatpush1.bf16.msra.mxu1 %v1831_v0 }
  0xc1   : > { %1122 = vmatprep.subr.bf16.mxu0 %v1836_v22  ;;  %1163 = vmatprep.subr.bf16.mxu1 %v1839_v23 }
  0xc4   : > { %1123 = vmatpush1.bf16.msra.mxu0 %v1834_v24  ;;  %1164 = vmatpush1.bf16.msra.mxu1 %v1837_v25 }
  0xc5   : > { %1124 = vmatprep.subr.bf16.mxu0 %v1842_v26  ;;  %1165 = vmatprep.subr.bf16.mxu1 %v1845_v27 }
  0xc8   : > { %1125 = vmatpush1.bf16.msra.mxu0 %v1840_v28  ;;  %1166 = vmatpush1.bf16.msra.mxu1 %v1843_v29 }
  0xc9   : > { %1126 = vmatprep.subr.bf16.mxu0 %v1848_v30  ;;  %1167 = vmatprep.subr.bf16.mxu1 %v1851_v31 }
  0xcc   : > { %1127 = vmatpush1.bf16.msra.mxu0 %v1846_v32  ;;  %1168 = vmatpush1.bf16.msra.mxu1 %v1849_v33 }
  0xcf   : > { %1145 = vmatmul.mubr.bf16.vlgmr.msra.gmra.mrb[8].mxu0 %v2325_v35  ;;  %1186 = vmatmul.mubr.bf16.vlgmr.msra.gmra.mrb[8].mxu1 %v2325_v35  ;;  %v419_v35 = vrot.slane %v2341_v39, %v418_v38 }
 0x162   : > { %v982_v45 = vpop.f32.mrb[0].mxu0  ;;  %v1023_v46 = vpop.f32.mrb[0].mxu1 }
 0x163   : > { %v983_v47 = vadd.f32 %v982_v45, %v411_v42  ;;  %v1024_v48 = vadd.f32 %v1023_v46, %v419_v35  ;;  %v984_v49 = vpop.f32.mrb[1].mxu0  ;;  %v1025_v50 = vpop.f32.mrb[1].mxu1 }
 0x164   : > { %v985_v51 = vadd.f32 %v984_v49, %v415_v43  ;;  %v1026_v52 = vadd.f32 %v1025_v50, %v423_v44  ;;  %v986_v53 = vpop.f32.mrb[2].mxu0  ;;  %v1027_v54 = vpop.f32.mrb[2].mxu1 }
 0x165   : > { %v987_v55 = vpop.f32.mrb[3].mxu0  ;;  %v1028_v56 = vpop.f32.mrb[3].mxu1 }
 0x166   : > { %v1603_v57 = vpack.c.bf16 %v985_v51, %v983_v47  ;;  %v1604_v58 = vpack.c.bf16 %v1026_v52, %v1024_v48 }
 0x168   : > { %1210 = vst [vmem:[%s291_s16] sm:$0xff] %v1603_v57  ;;  %1211 = vst [vmem:[%s291_s16 + $0x8] sm:$0xff] %v1604_v58 }
 0x169   : > { %1951 = shalt.err (!%p1948_p1)
}
 0x16a   : > { %s1952_s10 = scalar_lea.hbm %s2368_s8, 256  ;;  %s1956_s29 = scalar_lea.hbm %s2503_s3, 512 }
 0x16b   : > { %p1953_p6 = scmp.ne.s32.totalorder %s2368_s8, %s1952_s10  ;;  %p1957_p4 = scmp.lt.u32.totalorder %s2368_s8, %s2503_s3 }
 0x16c   : > { %p1958_p9 = scmp.lt.u32.totalorder %s1956_s29, %s1952_s10  ;;  %p1960_p11 = scmp.lt.u32.totalorder %s1952_s10, %s2368_s8 }
 0x16d   : > { %p1954_p10 = pnand %p1953_p6, %p2519_p2 }
 0x16e   : > { %p1959_p8 = por %p1958_p9, %p1957_p4 }
 0x16f   : > { %p1955_p3 = pneg %p1954_p10 }
 0x170   : > { %p1961_p13 = por %p1960_p11, %p1959_p8 }
 0x172   : > { %p1962_p5 = pnand %p1961_p13, %p1955_p3 }
 0x174   : > { %1965 = shalt.err (!%p1962_p5)
}
 0x175   : > { %1622 = dma.vmem_to_hbm [thread:$0]  (%p2519_p2), %s2370_s17, 256, %s2368_s8, %s1249_s21   ;;  %v426_v59 = vsub.s32 4, %v2337_v36  ;;  %v434_v60 = vsub.s32 6, %v2337_v36  ;;  %v430_v61 = vsub.s32 5, %v2337_v36  ;;  %v438_v62 = vsub.s32 7, %v2337_v36 }
 0x176   : > { %s1253_s17 = sand.u32 1, %s2156_s24   ;;  %s298_s8 = scalar_lea.vmem [#allocation9], %s2352_s26 }
 0x177   : > { %v427_v63 = vrot.slane %v2341_v39, %v426_v59  ;;  %v435_v1 = vrot.slane %v2341_v39, %v434_v60  ;;  %v431_v2 = vrot.slane %v2341_v39, %v430_v61  ;;  %v439_v3 = vrot.slane %v2341_v39, %v438_v62  ;;  %s1291_s21 = sshll.u32 %s298_s8, 4  ;;  %s2408_s30 = scalar_lea.hbm %s2504_s4, %s2361_s28  ;;  %s2410_s21 = int_to_ptr.vmem [resolvable:$true] %s1291_s21 }
 0x178   : > { %s2412_s24 = scalar_lea.sflag [#allocation10], %s1253_s17  ;;  %s1966_s10 = scalar_lea.vmem %s2410_s21, 256 }
 0x179   : > { %p1967_p7 = scmp.ne.s32.totalorder %s2410_s21, %s1966_s10  ;;  %s2093_s11 = smov [#allocation9]  }
 0x17a   : > { %s1970_s16 = sshll.u32 %s2093_s11, 4  ;;  %s1971_s16 = int_to_ptr.vmem [resolvable:$false] %s1970_s16 }
 0x17b   : > { %p1968_p12 = pnand %p1967_p7, %p2519_p2  ;;  %s1972_s29 = scalar_lea.vmem %s1971_s16, 512 }
 0x17c   : > { %p1973_p1 = scmp.lt.s32.totalorder %s2410_s21, %s1971_s16  ;;  %p1974_p6 = scmp.lt.s32.totalorder %s1972_s29, %s1966_s10 }
 0x17d   : > { %p1969_p0 = pneg %p1968_p12 }
 0x17e   : > { %p1975_p10 = por %p1974_p6, %p1973_p1 }
 0x180   : > { %p1976_p3 = pnand %p1975_p10, %p1969_p0 }
 0x182   : > { %v1064_v4 = vpop.f32.mrb[4].mxu0  ;;  %v1105_v5 = vpop.f32.mrb[4].mxu1 }
 0x183   : > { %v1065_v6 = vadd.f32 %v1064_v4, %v427_v63  ;;  %v1106_v7 = vadd.f32 %v1105_v5, %v435_v1  ;;  %v1066_v8 = vpop.f32.mrb[5].mxu0  ;;  %v1107_v9 = vpop.f32.mrb[5].mxu1 }
 0x184   : > { %v1067_v10 = vadd.f32 %v1066_v8, %v431_v2  ;;  %v1108_v11 = vadd.f32 %v1107_v9, %v439_v3  ;;  %v1068_v12 = vpop.f32.mrb[6].mxu0  ;;  %v1109_v13 = vpop.f32.mrb[6].mxu1 }
 0x185   : > { %v1069_v14 = vpop.f32.mrb[7].mxu0  ;;  %v1110_v15 = vpop.f32.mrb[7].mxu1 }
 0x186   : > { %v1605_v16 = vpack.c.bf16 %v1067_v10, %v1065_v6  ;;  %v1606_v17 = vpack.c.bf16 %v1108_v11, %v1106_v7 }
 0x188   : > { %1228 = vst [vmem:[%s298_s8] sm:$0xff] %v1605_v16  ;;  %1229 = vst [vmem:[%s298_s8 + $0x8] sm:$0xff] %v1606_v17 }
 0x189   : > { %1979 = shalt.err (!%p1976_p3)
}
 0x18a   : > { %s1980_s9 = scalar_lea.hbm %s2408_s30, 256  ;;  %s1984_s8 = scalar_lea.hbm %s2504_s4, 512 }
 0x18b   : > { %p1981_p4 = scmp.ne.s32.totalorder %s2408_s30, %s1980_s9  ;;  %p1985_p11 = scmp.lt.u32.totalorder %s2408_s30, %s2504_s4 }
 0x18c   : > { %p1986_p13 = scmp.lt.u32.totalorder %s1984_s8, %s1980_s9  ;;  %p1988_p7 = scmp.lt.u32.totalorder %s1980_s9, %s2408_s30 }
 0x18d   : > { %p1982_p9 = pnand %p1981_p4, %p2519_p2 }
 0x18e   : > { %p1987_p5 = por %p1986_p13, %p1985_p11 }
 0x18f   : > { %p1983_p8 = pneg %p1982_p9 }
 0x190   : > { %p1989_p12 = por %p1988_p7, %p1987_p5 }
 0x192   : > { %p1990_p0 = pnand %p1989_p12, %p1983_p8 }
 0x194   : > { %1993 = shalt.err (!%p1990_p0)
}
 0x195   : > { %1623 = dma.vmem_to_hbm [thread:$0]  (%p2519_p2), %s2410_s21, 256, %s2408_s30, %s2412_s24   ;;  %v405_v18 = vld [vmem:[#allocation7 + $0x8] sm:$0xf] }
 0x196   : > { %v443_v19 = vrot.slane %v405_v18, %v410_v37  ;;  %v451_v20 = vrot.slane %v405_v18, %v418_v38  ;;  %v447_v21 = vrot.slane %v405_v18, %v414_v40  ;;  %v455_v0 = vrot.slane %v405_v18, %v422_v41  ;;  %s305_s21 = scalar_lea.vmem [#allocation11], %s2352_s26  ;;  %s2449_s16 = scalar_lea.hbm %s2505_s5, %s2361_s28 }
 0x197   : > { %s1307_s30 = sshll.u32 %s305_s21, 4  ;;  %s2094_s29 = smov [#allocation11]   ;;  %s2451_s30 = int_to_ptr.vmem [resolvable:$true] %s1307_s30 }
 0x198   : > { %s1994_s26 = scalar_lea.vmem %s2451_s30, 256  ;;  %s1998_s9 = sshll.u32 %s2094_s29, 4  ;;  %s1999_s9 = int_to_ptr.vmem [resolvable:$false] %s1998_s9 }
 0x199   : > { %p1995_p1 = scmp.ne.s32.totalorder %s2451_s30, %s1994_s26  ;;  %s2000_s15 = scalar_lea.vmem %s1999_s9, 512 }
 0x19a   : > { %p2001_p3 = scmp.lt.s32.totalorder %s2451_s30, %s1999_s9  ;;  %p2002_p4 = scmp.lt.s32.totalorder %s2000_s15, %s1994_s26 }
 0x19b   : > { %p1996_p6 = pnand %p1995_p1, %p2519_p2 }
 0x19c   : > { %p2003_p9 = por %p2002_p4, %p2001_p3 }
 0x19d   : > { %p1997_p10 = pneg %p1996_p6 }
 0x19f   : > { %p2004_p8 = pnand %p2003_p9, %p1997_p10 }
 0x1a2   : > { %v1146_v22 = vpop.f32.mrb[8].mxu0  ;;  %v1187_v23 = vpop.f32.mrb[8].mxu1 }
 0x1a3   : > { %v1147_v24 = vadd.f32 %v1146_v22, %v443_v19  ;;  %v1188_v25 = vadd.f32 %v1187_v23, %v451_v20  ;;  %v1148_v26 = vpop.f32.mrb[9].mxu0  ;;  %v1189_v27 = vpop.f32.mrb[9].mxu1 }
 0x1a4   : > { %v1149_v28 = vadd.f32 %v1148_v26, %v447_v21  ;;  %v1190_v29 = vadd.f32 %v1189_v27, %v455_v0  ;;  %v1150_v30 = vpop.f32.mrb[10].mxu0  ;;  %v1191_v31 = vpop.f32.mrb[10].mxu1 }
 0x1a5   : > { %v1151_v32 = vpop.f32.mrb[11].mxu0  ;;  %v1192_v33 = vpop.f32.mrb[11].mxu1 }
 0x1a6   : > { %v1607_v34 = vpack.c.bf16 %v1149_v28, %v1147_v24  ;;  %v1608_v37 = vpack.c.bf16 %v1190_v29, %v1188_v25 }
 0x1a8   : > { %1246 = vst [vmem:[%s305_s21] sm:$0xff] %v1607_v34  ;;  %1247 = vst [vmem:[%s305_s21 + $0x8] sm:$0xff] %v1608_v37 }
 0x1a9   : > { %2007 = shalt.err (!%p2004_p8)
}
 0x1aa   : > { %s2008_s28 = scalar_lea.hbm %s2449_s16, 256  ;;  %s2012_s12 = scalar_lea.hbm %s2505_s5, 512 }
 0x1ab   : > { %p2009_p11 = scmp.ne.s32.totalorder %s2449_s16, %s2008_s28  ;;  %p2013_p7 = scmp.lt.u32.totalorder %s2449_s16, %s2505_s5 }
 0x1ac   : > { %p2014_p12 = scmp.lt.u32.totalorder %s2012_s12, %s2008_s28  ;;  %p2016_p1 = scmp.lt.u32.totalorder %s2008_s28, %s2449_s16 }
 0x1ad   : > { %p2010_p13 = pnand %p2009_p11, %p2519_p2 }
 0x1ae   : > { %p2015_p0 = por %p2014_p12, %p2013_p7 }
 0x1af   : > { %p2011_p5 = pneg %p2010_p13 }
 0x1b0   : > { %p2017_p6 = por %p2016_p1, %p2015_p0 }
 0x1b2   : > { %p2018_p10 = pnand %p2017_p6, %p2011_p5 }
 0x1b4   : > { %2021 = shalt.err (!%p2018_p10)
}
 0x1b5   : > { %1624 = dma.vmem_to_hbm [thread:$0]  (%p2519_p2), %s2451_s30, 256, %s2449_s16, %s2412_s24  }
 0x1b6 PF: > { %s1319_s10 = sand.u32 1, %s2064_s18   ;;  %p2520_p3 = scmp.ne.s32.totalorder %s2510_s27, 0 }
 0x1b7   : > { %p2521_p4 = scmp.ge.s32.totalorder %s2084_s23, 2  ;;  %s1320_s11 = scalar_lea.sflag [#allocation4], %s1319_s10 }
 0x1b9   : > { %p1640_p9 = pnand %p2521_p4, %p2520_p3 }
 0x1bb   : > { %2055 = dma.done.wait (!%p1640_p9), %s1320_s11, 256  }
 0x1bc   : > { %2057 = vsyncadd (!%p1640_p9), %s1320_s11, 4294967040  ;;  %s1328_s26 = sand.u32 1, %s1476_s25  }
 0x1bd   : > { %s1329_s29 = scalar_lea.sflag [#allocation10], %s1328_s26 }
 0x1be   : > { %2059 = dma.done.wait (!%p1640_p9), %s1329_s29, 512  }
 0x1bf   : > { %2061 = vsyncadd (!%p1640_p9), %s1329_s29, 4294966784  ;;  %s26_s23 = sadd.s32 1, %s2084_s23   ;;  %s2522_s18 = smov %s2068_s19 }
 0x1c0   : > { %p23_p2 = scmp.ge.s32.totalorder %s26_s23, 4   ;;  %s2523_s19 = smov %s2072_s20 }
 0x1c1   : > { %s2524_s20 = smov %s2265_s13  ;;  %s2525_s21 = smov %s2080_s22 }
 0x1c2   : > { %s2526_s22 = smov %s2528_s7  ;;  %25 = sbr.rel (!%p23_p2) target bundleno = 9 (0x9), region = 117 }
 0x1c9   :  { %1343 = vsyncpa [#allocation3], 1 }
 0x1ca   :  { %1345 = vsyncpa [#allocation3 + $0x1], 1 }
 0x1cb   :  { %1346 = vsyncpa [#allocation6], 1 }
 0x1cc   :  { %1347 = vsyncpa [#allocation4], 1 }
 0x1cd   :  { %1349 = vsyncpa [#allocation4 + $0x1], 1 }
 0x1ce   :  { %1350 = vsyncpa [#allocation10], 1 }
 0x1cf   :  { %1352 = vsyncpa [#allocation10 + $0x1], 1 }

</bundles_post_ra>
